<compile_context>
chip_gen: v5e
topology: v5e:2x2
jax: 0.10.0
libtpu: 0.0.40
codegen_flags: <defaults>
</compile_context>

<pallas_src>
import jax
import jax.numpy as jnp
from jax.experimental import pallas as pl
from jax.experimental.pallas import tpu as pltpu

EPS = 1e-5  # PyTorch BatchNorm1d default eps


# ---------------------------------------------------------------------------
# Kernel: 4 fused (matmul + bias + ReLU) layers; BN already folded into (w, b).
# ---------------------------------------------------------------------------
def pose_embedding_kernel(x_ref,
                          w1_ref, b1_ref,
                          w2_ref, b2_ref,
                          w3_ref, b3_ref,
                          w4_ref, b4_ref,
                          o_ref):
    cd = w1_ref.dtype  # bf16 compute dtype for MXU operands
    # Layer 1: (TM,99) @ (99,512)  [BN1 folded]; x cast to bf16 in-kernel.
    h = jnp.dot(x_ref[...].astype(cd), w1_ref[...],
                preferred_element_type=jnp.float32) + b1_ref[...]
    h = jnp.maximum(h, 0.0).astype(cd)          # ReLU in f32, cast back for MXU
    # Layer 2: (TM,512) @ (512,256)  [BN2 folded]
    h = jnp.dot(h, w2_ref[...], preferred_element_type=jnp.float32) + b2_ref[...]
    h = jnp.maximum(h, 0.0).astype(cd)
    # Layer 3: (TM,256) @ (256,128)  [BN3 folded]
    h = jnp.dot(h, w3_ref[...], preferred_element_type=jnp.float32) + b3_ref[...]
    h = jnp.maximum(h, 0.0).astype(cd)
    # Layer 4: (TM,128) @ (128,128)  (no BN / no ReLU)
    o_ref[...] = (jnp.dot(h, w4_ref[...], preferred_element_type=jnp.float32)
                  + b4_ref[...]).astype(o_ref.dtype)


# ---------------------------------------------------------------------------
# Parameter init (PyTorch-default-like) and one-time prep (BN fold, cast).
# ---------------------------------------------------------------------------
def init_params(key, input_size=99, embedding_size=128):
    dims = [(input_size, 512), (512, 256), (256, 128), (128, embedding_size)]
    params = {}
    for i, (fan_in, fan_out) in enumerate(dims, start=1):
        key, kw, kb = jax.random.split(key, 3)
        bound = 1.0 / (fan_in ** 0.5)
        params[f"w{i}"] = jax.random.uniform(kw, (fan_in, fan_out), jnp.float32, -bound, bound)
        params[f"b{i}"] = jax.random.uniform(kb, (1, fan_out), jnp.float32, -bound, bound)
    for i, n in enumerate([512, 256, 128], start=1):
        params[f"g{i}"] = jnp.ones((1, n), jnp.float32)     # BN weight (gamma)
        params[f"be{i}"] = jnp.zeros((1, n), jnp.float32)   # BN bias (beta)
        params[f"m{i}"] = jnp.zeros((1, n), jnp.float32)    # running_mean
        params[f"v{i}"] = jnp.ones((1, n), jnp.float32)     # running_var
    return params


def prepare_params(params, compute_dtype=jnp.bfloat16):
    """One-time prep: fold eval-mode BN into Linear, cast weights to bf16."""
    prepped = {}
    for i in (1, 2, 3):
        w, b = params[f"w{i}"], params[f"b{i}"]
        g, be = params[f"g{i}"], params[f"be{i}"]
        m, v = params[f"m{i}"], params[f"v{i}"]
        scale = g * jax.lax.rsqrt(v + EPS)                  # (1, N)
        w = w * scale                                       # W' = W * scale
        b = (b - m) * scale + be                            # b' = (b - mean)*scale + beta
        prepped[f"w{i}"] = w.astype(compute_dtype)
        prepped[f"b{i}"] = b.astype(jnp.float32)            # bias add stays f32
    prepped["w4"] = params["w4"].astype(compute_dtype)
    prepped["b4"] = params["b4"].astype(jnp.float32)
    return prepped


# ---------------------------------------------------------------------------
# Batch-tile chooser (review feedback):
#   * small batch: round up to 16 (bf16 output sublane packing).
#   * large batch: at least 2 tiles (v7x megacore balance), tile rounded to 256,
#     capped at 1024 (fits VMEM on every generation incl. v7x's 64 MiB/TC).
# ---------------------------------------------------------------------------
def _round_up(x, m):
    return ((x + m - 1) // m) * m


def _choose_tile_m(batch, max_tm=1024):
    if batch <= 256:
        return max(16, _round_up(batch, 16))
    tm = _round_up(pl.cdiv(batch, 2), 256)   # >= 2 tiles -> both TCs get work
    return min(tm, max_tm)


# ---------------------------------------------------------------------------
# Wrapper: batch grid, weights resident in VMEM across grid steps.
# ---------------------------------------------------------------------------
def pose_embedding_forward(x, prepped, embedding_size=128, tile_m=None,
                           out_dtype=jnp.bfloat16):
    B, F = x.shape
    tm = tile_m or _choose_tile_m(B)
    n_tiles = pl.cdiv(B, tm)
    b_pad = n_tiles * tm

    # Only a batch pad (no feature pad, no dtype cast) — and only if needed.
    x_p = x if b_pad == B else jnp.pad(x, ((0, b_pad - B), (0, 0)))

    # x is tiled over the batch grid; all weights/biases use a constant
    # index_map -> DMA'd once, resident in VMEM for every grid step.
    args = [x_p]
    in_specs = [pl.BlockSpec((tm, F), lambda i: (i, 0))]   # last dim = full array dim
    for layer in (1, 2, 3, 4):
        w = prepped[f"w{layer}"]
        b = prepped[f"b{layer}"]
        in_specs.append(pl.BlockSpec(w.shape, lambda i: (0, 0)))
        in_specs.append(pl.BlockSpec(b.shape, lambda i: (0, 0)))
        args += [w, b]
    out_specs = pl.BlockSpec((tm, embedding_size), lambda i: (i, 0))

    flops = 2 * b_pad * (F * 512 + 512 * 256 + 256 * 128 + 128 * embedding_size)
    weight_bytes = sum(int(v.size) * v.dtype.itemsize for v in prepped.values())
    bytes_accessed = (weight_bytes
                      + int(x_p.size) * x_p.dtype.itemsize
                      + b_pad * embedding_size * jnp.dtype(out_dtype).itemsize)

    out = pl.pallas_call(
        pose_embedding_kernel,
        out_shape=jax.ShapeDtypeStruct((b_pad, embedding_size), out_dtype),
        grid_spec=pltpu.PrefetchScalarGridSpec(
            num_scalar_prefetch=0,
            grid=(n_tiles,),
            in_specs=in_specs,
            out_specs=out_specs,
        ),
        compiler_params=pltpu.CompilerParams(
            dimension_semantics=("parallel",),           # megacore shard on v7x
            vmem_limit_bytes=48 * 1024 * 1024),          # clear v5e's 16 MiB default
        cost_estimate=pl.CostEstimate(
            flops=flops, transcendentals=0, bytes_accessed=bytes_accessed),
    )(*args)
    return out[:B]


# ---------------------------------------------------------------------------
# Pure-JAX references for correctness checks.
# ---------------------------------------------------------------------------
def _bn_eval(h, gamma, beta, mean, var):
    return (h - mean) * jax.lax.rsqrt(var + EPS) * gamma + beta


def _reference_f32(x, params):
    """Original (unfolded, f32) eval-mode forward."""
    h = x @ params["w1"] + params["b1"]
    h = jnp.maximum(_bn_eval(h, params["g1"], params["be1"], params["m1"], params["v1"]), 0.0)
    h = h @ params["w2"] + params["b2"]
    h = jnp.maximum(_bn_eval(h, params["g2"], params["be2"], params["m2"], params["v2"]), 0.0)
    h = h @ params["w3"] + params["b3"]
    h = jnp.maximum(_bn_eval(h, params["g3"], params["be3"], params["m3"], params["v3"]), 0.0)
    return h @ params["w4"] + params["b4"]


def _reference_prepped(x, prepped):
    """Same folded/bf16 math as the kernel, in plain JAX."""
    cd = prepped["w1"].dtype
    h = x.astype(cd)
    for i in (1, 2, 3):
        h = jnp.dot(h, prepped[f"w{i}"], preferred_element_type=jnp.float32) + prepped[f"b{i}"]
        h = jnp.maximum(h, 0.0).astype(cd)
    return jnp.dot(h, prepped["w4"], preferred_element_type=jnp.float32) + prepped["b4"]


if __name__ == "__main__":
    key = jax.random.PRNGKey(0)
    k_x, k_p = jax.random.split(key)

    B, INPUT_SIZE, EMBEDDING_SIZE = 8, 99, 128
    x = jax.random.normal(k_x, (B, INPUT_SIZE), jnp.float32)
    params = init_params(k_p, INPUT_SIZE, EMBEDDING_SIZE)
    prepped = prepare_params(params)                        # one-time prep

    out = pose_embedding_forward(x, prepped, EMBEDDING_SIZE)
    out = jax.block_until_ready(out)
    assert out.shape == (B, EMBEDDING_SIZE)
    out_f32 = out.astype(jnp.float32)

    # Tight-ish check vs. a reference using the exact same folded bf16 params.
    ref_bf16 = _reference_prepped(x, prepped)
    assert jnp.allclose(out_f32, ref_bf16, rtol=2e-2, atol=2e-2), \
        "mismatch vs folded-bf16 reference"

    # Looser check vs. the original f32 (unfolded BN) eval forward.
    ref_f32 = _reference_f32(x, params)
    assert jnp.allclose(out_f32, ref_f32, rtol=5e-2, atol=5e-2), \
        "mismatch vs f32 reference"

    print("KERNEL_OK")
</pallas_src>

<mosaic_0001>
module attributes {stable_mosaic.version = 11 : i64} {
  func.func @pose_embedding_kernel(%arg0: i32, %arg1: memref<16x99xf32, #tpu.memory_space<vmem>>, %arg2: memref<99x512xbf16, #tpu.memory_space<vmem>>, %arg3: memref<1x512xf32, #tpu.memory_space<vmem>>, %arg4: memref<512x256xbf16, #tpu.memory_space<vmem>>, %arg5: memref<1x256xf32, #tpu.memory_space<vmem>>, %arg6: memref<256x128xbf16, #tpu.memory_space<vmem>>, %arg7: memref<1x128xf32, #tpu.memory_space<vmem>>, %arg8: memref<128x128xbf16, #tpu.memory_space<vmem>>, %arg9: memref<1x128xf32, #tpu.memory_space<vmem>>, %arg10: memref<16x128xbf16, #tpu.memory_space<vmem>>) attributes {dimension_semantics = [#tpu.dimension_semantics<parallel>], iteration_bounds = array<i64: 1>, scalar_prefetch = 0 : i64, scratch_operands = 0 : i64, tpu.core_type = #tpu.core_type<tc>, window_params = [{transform_indices = @transform_0, window_bounds = array<i64: 16, 99>}, {pipeline_mode = #tpu.pipeline_mode<synchronous>, transform_indices = @transform_1, window_bounds = array<i64: 99, 512>}, {pipeline_mode = #tpu.pipeline_mode<synchronous>, transform_indices = @transform_2, window_bounds = array<i64: 1, 512>}, {pipeline_mode = #tpu.pipeline_mode<synchronous>, transform_indices = @transform_3, window_bounds = array<i64: 512, 256>}, {pipeline_mode = #tpu.pipeline_mode<synchronous>, transform_indices = @transform_4, window_bounds = array<i64: 1, 256>}, {pipeline_mode = #tpu.pipeline_mode<synchronous>, transform_indices = @transform_5, window_bounds = array<i64: 256, 128>}, {pipeline_mode = #tpu.pipeline_mode<synchronous>, transform_indices = @transform_6, window_bounds = array<i64: 1, 128>}, {pipeline_mode = #tpu.pipeline_mode<synchronous>, transform_indices = @transform_7, window_bounds = array<i64: 128, 128>}, {pipeline_mode = #tpu.pipeline_mode<synchronous>, transform_indices = @transform_8, window_bounds = array<i64: 1, 128>}, {transform_indices = @transform_9, window_bounds = array<i64: 16, 128>}]} {
    %c0 = arith.constant 0 : index
    %c0_0 = arith.constant 0 : index
    %0 = vector.load %arg1[%c0, %c0_0] : memref<16x99xf32, #tpu.memory_space<vmem>>, vector<16x99xf32>
    %1 = arith.truncf %0 : vector<16x99xf32> to vector<16x99xbf16>
    %c0_1 = arith.constant 0 : index
    %c0_2 = arith.constant 0 : index
    %2 = vector.load %arg2[%c0_1, %c0_2] : memref<99x512xbf16, #tpu.memory_space<vmem>>, vector<99x512xbf16>
    %cst = arith.constant dense<0.000000e+00> : vector<16x512xf32>
    %3 = tpu.matmul %1, %2, %cst {dimension_numbers = #tpu.dot_dimension_numbers<[1], [0], [0], [1], [0, 0, 1, 1], [], []>} : vector<16x99xbf16>, vector<99x512xbf16>, vector<16x512xf32> -> vector<16x512xf32>
    %c0_3 = arith.constant 0 : index
    %c0_4 = arith.constant 0 : index
    %4 = vector.load %arg3[%c0_3, %c0_4] : memref<1x512xf32, #tpu.memory_space<vmem>>, vector<1x512xf32>
    %5 = vector.broadcast %4 : vector<1x512xf32> to vector<16x512xf32>
    %6 = arith.addf %3, %5 : vector<16x512xf32>
    %cst_5 = arith.constant 0.000000e+00 : f32
    %7 = vector.broadcast %cst_5 : f32 to vector<16x512xf32>
    %8 = arith.maximumf %6, %7 : vector<16x512xf32>
    %9 = arith.truncf %8 : vector<16x512xf32> to vector<16x512xbf16>
    %c0_6 = arith.constant 0 : index
    %c0_7 = arith.constant 0 : index
    %10 = vector.load %arg4[%c0_6, %c0_7] : memref<512x256xbf16, #tpu.memory_space<vmem>>, vector<512x256xbf16>
    %cst_8 = arith.constant dense<0.000000e+00> : vector<16x256xf32>
    %11 = tpu.matmul %9, %10, %cst_8 {dimension_numbers = #tpu.dot_dimension_numbers<[1], [0], [0], [1], [0, 0, 1, 1], [], []>} : vector<16x512xbf16>, vector<512x256xbf16>, vector<16x256xf32> -> vector<16x256xf32>
    %c0_9 = arith.constant 0 : index
    %c0_10 = arith.constant 0 : index
    %12 = vector.load %arg5[%c0_9, %c0_10] : memref<1x256xf32, #tpu.memory_space<vmem>>, vector<1x256xf32>
    %13 = vector.broadcast %12 : vector<1x256xf32> to vector<16x256xf32>
    %14 = arith.addf %11, %13 : vector<16x256xf32>
    %cst_11 = arith.constant 0.000000e+00 : f32
    %15 = vector.broadcast %cst_11 : f32 to vector<16x256xf32>
    %16 = arith.maximumf %14, %15 : vector<16x256xf32>
    %17 = arith.truncf %16 : vector<16x256xf32> to vector<16x256xbf16>
    %c0_12 = arith.constant 0 : index
    %c0_13 = arith.constant 0 : index
    %18 = vector.load %arg6[%c0_12, %c0_13] : memref<256x128xbf16, #tpu.memory_space<vmem>>, vector<256x128xbf16>
    %cst_14 = arith.constant dense<0.000000e+00> : vector<16x128xf32>
    %19 = tpu.matmul %17, %18, %cst_14 {dimension_numbers = #tpu.dot_dimension_numbers<[1], [0], [0], [1], [0, 0, 1, 1], [], []>} : vector<16x256xbf16>, vector<256x128xbf16>, vector<16x128xf32> -> vector<16x128xf32>
    %c0_15 = arith.constant 0 : index
    %c0_16 = arith.constant 0 : index
    %20 = vector.load %arg7[%c0_15, %c0_16] : memref<1x128xf32, #tpu.memory_space<vmem>>, vector<1x128xf32>
    %21 = vector.broadcast %20 : vector<1x128xf32> to vector<16x128xf32>
    %22 = arith.addf %19, %21 : vector<16x128xf32>
    %cst_17 = arith.constant 0.000000e+00 : f32
    %23 = vector.broadcast %cst_17 : f32 to vector<16x128xf32>
    %24 = arith.maximumf %22, %23 : vector<16x128xf32>
    %25 = arith.truncf %24 : vector<16x128xf32> to vector<16x128xbf16>
    %c0_18 = arith.constant 0 : index
    %c0_19 = arith.constant 0 : index
    %26 = vector.load %arg8[%c0_18, %c0_19] : memref<128x128xbf16, #tpu.memory_space<vmem>>, vector<128x128xbf16>
    %cst_20 = arith.constant dense<0.000000e+00> : vector<16x128xf32>
    %27 = tpu.matmul %25, %26, %cst_20 {dimension_numbers = #tpu.dot_dimension_numbers<[1], [0], [0], [1], [0, 0, 1, 1], [], []>} : vector<16x128xbf16>, vector<128x128xbf16>, vector<16x128xf32> -> vector<16x128xf32>
    %c0_21 = arith.constant 0 : index
    %c0_22 = arith.constant 0 : index
    %28 = vector.load %arg9[%c0_21, %c0_22] : memref<1x128xf32, #tpu.memory_space<vmem>>, vector<1x128xf32>
    %29 = vector.broadcast %28 : vector<1x128xf32> to vector<16x128xf32>
    %30 = arith.addf %27, %29 : vector<16x128xf32>
    %31 = arith.truncf %30 : vector<16x128xf32> to vector<16x128xbf16>
    %c0_23 = arith.constant 0 : index
    %c0_24 = arith.constant 0 : index
    %32 = vector.load %arg10[%c0_23, %c0_24] : memref<16x128xbf16, #tpu.memory_space<vmem>>, vector<16x128xbf16>
    tpu.vector_store %arg10[%c0_23, %c0_24], %31 {strides = array<i32>} : memref<16x128xbf16, #tpu.memory_space<vmem>>, vector<16x128xbf16>,
    return
  }
  func.func @transform_0(%arg0: i32) -> (i32, i32) {
    %c0_i32 = arith.constant 0 : i32
    %c0_i32_0 = arith.constant 0 : i32
    return %arg0, %c0_i32 : i32, i32
  }
  func.func @transform_1(%arg0: i32) -> (i32, i32) {
    %c0_i32 = arith.constant 0 : i32
    %c0_i32_0 = arith.constant 0 : i32
    %c0_i32_1 = arith.constant 0 : i32
    return %c0_i32, %c0_i32_0 : i32, i32
  }
  func.func @transform_2(%arg0: i32) -> (i32, i32) {
    %c0_i32 = arith.constant 0 : i32
    %c0_i32_0 = arith.constant 0 : i32
    %c0_i32_1 = arith.constant 0 : i32
    return %c0_i32, %c0_i32_0 : i32, i32
  }
  func.func @transform_3(%arg0: i32) -> (i32, i32) {
    %c0_i32 = arith.constant 0 : i32
    %c0_i32_0 = arith.constant 0 : i32
    %c0_i32_1 = arith.constant 0 : i32
    return %c0_i32, %c0_i32_0 : i32, i32
  }
  func.func @transform_4(%arg0: i32) -> (i32, i32) {
    %c0_i32 = arith.constant 0 : i32
    %c0_i32_0 = arith.constant 0 : i32
    %c0_i32_1 = arith.constant 0 : i32
    return %c0_i32, %c0_i32_0 : i32, i32
  }
  func.func @transform_5(%arg0: i32) -> (i32, i32) {
    %c0_i32 = arith.constant 0 : i32
    %c0_i32_0 = arith.constant 0 : i32
    %c0_i32_1 = arith.constant 0 : i32
    return %c0_i32, %c0_i32_0 : i32, i32
  }
  func.func @transform_6(%arg0: i32) -> (i32, i32) {
    %c0_i32 = arith.constant 0 : i32
    %c0_i32_0 = arith.constant 0 : i32
    %c0_i32_1 = arith.constant 0 : i32
    return %c0_i32, %c0_i32_0 : i32, i32
  }
  func.func @transform_7(%arg0: i32) -> (i32, i32) {
    %c0_i32 = arith.constant 0 : i32
    %c0_i32_0 = arith.constant 0 : i32
    %c0_i32_1 = arith.constant 0 : i32
    return %c0_i32, %c0_i32_0 : i32, i32
  }
  func.func @transform_8(%arg0: i32) -> (i32, i32) {
    %c0_i32 = arith.constant 0 : i32
    %c0_i32_0 = arith.constant 0 : i32
    %c0_i32_1 = arith.constant 0 : i32
    return %c0_i32, %c0_i32_0 : i32, i32
  }
  func.func @transform_9(%arg0: i32) -> (i32, i32) {
    %c0_i32 = arith.constant 0 : i32
    %c0_i32_0 = arith.constant 0 : i32
    return %arg0, %c0_i32 : i32, i32
  }
}

</mosaic_0001>

<bundles_post_ra>
// kernel: tpu_custom_call.1
= control target key start
LH: loop header
LB: loop body
LE: loop exit
PB: predicated region body
PF: predicated region fallthrough
CT: control target
= control target key end

     0   :  { %14 = vsyncpa [#allocation3], 0  ;;  %s2054_s0 = inlined_call_operand.hbm [shape: f32[16,99], index: 0, kind: input, shape index: {}]   ;;  %s2055_s1 = inlined_call_operand.hbm [shape: bf16[99,512], index: 1, kind: input, shape index: {}]   ;;  %s2056_s2 = inlined_call_operand.hbm [shape: f32[1,512], index: 2, kind: input, shape index: {}]   ;;  %s2057_s3 = inlined_call_operand.hbm [shape: bf16[512,256], index: 3, kind: input, shape index: {}]   ;;  %s2058_s4 = inlined_call_operand.vmem [shape: f32[1,256], index: 4, kind: input, shape index: {}]   ;;  %s2059_s5 = inlined_call_operand.hbm [shape: bf16[256,128], index: 5, kind: input, shape index: {}]   ;;  %s2060_s6 = inlined_call_operand.vmem [shape: f32[1,128], index: 6, kind: input, shape index: {}]   ;;  %s2061_s7 = inlined_call_operand.hbm [shape: bf16[128,128], index: 7, kind: input, shape index: {}]   ;;  %s2062_s8 = inlined_call_operand.vmem [shape: f32[1,128], index: 8, kind: input, shape index: {}]   ;;  %s2063_s9 = inlined_call_operand.hbm [shape: bf16[16,128], index: 9, kind: output, shape index: {}]  }
   0x1   :  { %15 = vsyncpa [#allocation6], 0 }
   0x2   :  { %16 = vsyncpa [#allocation9], 0 }
   0x3   :  { %17 = vsyncpa [#allocation12], 0  ;;  %s36_s11 = sshll.u32 %s2055_s1, 4  ;;  %s37_s11 = int_to_ptr.hbm [resolvable:$true] %s36_s11 }
   0x4   :  { %18 = vsyncpa [#allocation4], 0  ;;  %s1925_s12 = smov [#allocation5]   ;;  %s1926_s14 = smov 256  }
   0x5   :  { %s38_s13 = sshll.u32 %s1925_s12, 4  ;;  %s1927_s15 = smov 16   ;;  %s39_s13 = int_to_ptr.vmem [resolvable:$true] %s38_s13 }
   0x6   :  { %44 = dma.hbm_to_vmem [thread:$0]  %s37_s11, 3328, %s39_s13, [#allocation6], %s1926_s14, %s1926_s14, %s1927_s15  }
   0x7   :  { %s60_s18 = sshll.u32 %s2057_s3, 4  ;;  %s1928_s19 = smov [#allocation8]   ;;  %s61_s18 = int_to_ptr.hbm [resolvable:$true] %s60_s18 }
   0x8   :  { %s62_s20 = sshll.u32 %s1928_s19, 4  ;;  %s23_s23 = sshll.u32 %s2054_s0, 4  ;;  %s63_s20 = int_to_ptr.vmem [resolvable:$true] %s62_s20  ;;  %s24_s23 = int_to_ptr.hbm [resolvable:$true] %s23_s23 }
   0x9   :  { %s1929_s1 = smov 128   ;;  %s1930_s24 = smov 8  }
   0xa   :  { %68 = dma.hbm_to_vmem [thread:$0]  %s61_s18, 8192, %s63_s20, [#allocation9], %s1929_s1, %s1929_s1, %s1930_s24  }
   0xb   :  { %s50_s27 = sshll.u32 %s2056_s2, 4  ;;  %s1931_s28 = smov [#allocation2]   ;;  %s51_s27 = int_to_ptr.hbm [resolvable:$true] %s50_s27 }
   0xc   :  { %s25_s29 = sshll.u32 %s1931_s28, 4  ;;  %s1932_s3 = smov [#allocation7]   ;;  %s26_s29 = int_to_ptr.vmem [resolvable:$true] %s25_s29 }
   0xd   :  { %31 = dma.hbm_to_vmem [thread:$0]  %s24_s23, 256, %s26_s29, [#allocation3], %s1929_s1, %s1929_s1, %s1930_s24  }
   0xe   :  { %s52_s30 = sshll.u32 %s1932_s3, 4  ;;  %s75_s0 = sshll.u32 %s2059_s5, 4  ;;  %s53_s30 = int_to_ptr.vmem [resolvable:$true] %s52_s30  ;;  %s76_s0 = int_to_ptr.hbm [resolvable:$true] %s75_s0 }
   0xf   :  { %55 = dma.hbm_to_vmem [thread:$0]  %s51_s27, 64, %s53_s30, [#allocation6]  }
  0x10   :  { %s1933_s12 = smov [#allocation10]   ;;  %s90_s2 = sshll.u32 %s2061_s7, 4  ;;  %s91_s2 = int_to_ptr.hbm [resolvable:$true] %s90_s2 }
  0x11   :  { %s77_s13 = sshll.u32 %s1933_s12, 4  ;;  %s1934_s16 = smov 64   ;;  %s78_s13 = int_to_ptr.vmem [resolvable:$true] %s77_s13 }
  0x12   :  { %s1935_s17 = smov 4   ;;  %s1936_s18 = smov [#allocation11]  }
  0x13   :  { %83 = dma.hbm_to_vmem [thread:$0]  %s76_s0, 2048, %s78_s13, [#allocation9], %s1934_s16, %s1934_s16, %s1935_s17  }
  0x14   :  { %s92_s19 = sshll.u32 %s1936_s18, 4  ;;  %s93_s19 = int_to_ptr.vmem [resolvable:$true] %s92_s19 }
  0x15   :  { %98 = dma.hbm_to_vmem [thread:$0]  %s91_s2, 1024, %s93_s19, [#allocation12], %s1934_s16, %s1934_s16, %s1935_s17  }
  0x16   :  { %1915 = dma.done.wait [#allocation3], 256  }
  0x17   :  { %1916 = vsyncadd [#allocation3], 4294967040 }
  0x18   :  { %1917 = dma.done.wait [#allocation6], 3392  }
  0x19   :  { %1918 = vsyncadd [#allocation6], 4294963904 }
  0x1a   :  { %1919 = dma.done.wait [#allocation9], 10240  }
  0x1b   :  { %1920 = vsyncadd [#allocation9], 4294957056 }
  0x1c   :  { %1921 = dma.done.wait [#allocation12], 1024  }
  0x1d   :  { %1922 = vsyncadd [#allocation12], 4294966272  ;;  %vm299_vm0 = vcmask 1040384   ;;  %vm300_vm1 = vcmask 1041408   ;;  %v1937_v0 = vmov 65535   ;;  %vm295_vm2 = vcmask 809984  }
  0x1e   :  { %v301_v1 = vsel %vm299_vm0, 4294967295, %v1937_v0  ;;  %v153_v2 = vld [vmem:[#allocation5 + $0xc0] sm:$0x33]  ;;  %v2013_v3 = vld [vmem:[#allocation5 + $0xc8] sm:$0x33]  ;;  %s1938_s23 = smov [#allocation13]  }
  0x1f   :  { %v239_v4 = vunpack.c.l.b16 %v153_v2  ;;  %v241_v5 = vunpack.c.l.b16 %v2013_v3  ;;  %v240_v6 = vunpack.c.h.b16 %v153_v2  ;;  %v2016_v7 = vsel %vm300_vm1, %v301_v1, 0  ;;  %v1244_v11 = vld [vmem:[#allocation5 + $0xa0] sm:$0xf]  ;;  %v1636_v12 = vld [vmem:[#allocation5 + $0xac] sm:$0xf0]  ;;  %s1144_s1 = sshll.u32 %s1938_s23, 4  ;;  %s1145_s1 = int_to_ptr.vmem [resolvable:$true] %s1144_s1 }
  0x20   :  { %v1252_v13 = vld [vmem:[#allocation5 + $0xa8] sm:$0xf]  ;;  %v1637_v14 = vld [vmem:[#allocation5 + $0xb4] sm:$0xf0]  ;;  %v1634_v18 = vld [vmem:[#allocation5 + $0xa4] sm:$0xf]  ;;  %v1245_v20 = vor.u32 %v1636_v12, %v1244_v11  ;;  %v242_v54 = vunpack.c.h.b16 %v2013_v3 }
  0x21   :  { %v267_v8 = vpack.c.b16 %v239_v4, %v239_v4  ;;  %v269_v9 = vpack.c.b16 %v241_v5, %v241_v5  ;;  %v268_v10 = vpack.c.b16 %v240_v6, %v240_v6  ;;  %v1246_v19 = vld [vmem:[#allocation5 + $0xb0] sm:$0xf0]  ;;  %v1253_v21 = vor.u32 %v1637_v14, %v1252_v13  ;;  %v1228_v22 = vld [vmem:[#allocation5 + $0x80] sm:$0xf]  ;;  %v1632_v24 = vld [vmem:[#allocation5 + $0x8c] sm:$0xf0] }
  0x22   :  { %v1249_v23 = vor.u32 %v1634_v18, %v1246_v19  ;;  %v1236_v25 = vld [vmem:[#allocation5 + $0x88] sm:$0xf]  ;;  %v1633_v26 = vld [vmem:[#allocation5 + $0x94] sm:$0xf0]  ;;  %v1630_v27 = vld [vmem:[#allocation5 + $0x84] sm:$0xf]  ;;  %v1229_v29 = vor.u32 %v1632_v24, %v1228_v22  ;;  %v270_v0 = vpack.c.b16 %v242_v54, %v242_v54 }
  0x23   :  { %v304_v15 = vand.u32 %v2016_v7, %v267_v8  ;;  %v310_v16 = vand.u32 %v2016_v7, %v269_v9  ;;  %v307_v17 = vand.u32 %v2016_v7, %v268_v10  ;;  %v1230_v28 = vld [vmem:[#allocation5 + $0x90] sm:$0xf0]  ;;  %v1237_v30 = vor.u32 %v1633_v26, %v1236_v25  ;;  %v1212_v31 = vld [vmem:[#allocation5 + $0x60] sm:$0xf]  ;;  %v1628_v33 = vld [vmem:[#allocation5 + $0x6c] sm:$0xf0] }
  0x24   :  { %v1233_v32 = vor.u32 %v1630_v27, %v1230_v28  ;;  %v1220_v34 = vld [vmem:[#allocation5 + $0x68] sm:$0xf]  ;;  %v1629_v35 = vld [vmem:[#allocation5 + $0x74] sm:$0xf0]  ;;  %v1626_v36 = vld [vmem:[#allocation5 + $0x64] sm:$0xf]  ;;  %v1213_v38 = vor.u32 %v1628_v33, %v1212_v31  ;;  %v313_v12 = vand.u32 %v2016_v7, %v270_v0 }
  0x25   :  { %316 = vmatpush.bf16.msra.mxu3 %v304_v15  ;;  %344 = vmatpush.bf16.msra.mxu2 %v310_v16  ;;  %v1214_v37 = vld [vmem:[#allocation5 + $0x70] sm:$0xf0]  ;;  %v1221_v39 = vor.u32 %v1629_v35, %v1220_v34  ;;  %v1196_v40 = vld [vmem:[#allocation5 + $0x40] sm:$0xf]  ;;  %v1624_v41 = vld [vmem:[#allocation5 + $0x4c] sm:$0xf0] }
  0x26   :  { %330 = vmatpush.bf16.msra.mxu1 %v307_v17  ;;  %v1217_v42 = vor.u32 %v1626_v36, %v1214_v37  ;;  %v1204_v43 = vld [vmem:[#allocation5 + $0x48] sm:$0xf]  ;;  %v1625_v44 = vld [vmem:[#allocation5 + $0x54] sm:$0xf0]  ;;  %v1622_v45 = vld [vmem:[#allocation5 + $0x44] sm:$0xf]  ;;  %v1197_v47 = vor.u32 %v1624_v41, %v1196_v40 }
  0x27   :  { %v1198_v46 = vld [vmem:[#allocation5 + $0x50] sm:$0xf0]  ;;  %v1205_v48 = vor.u32 %v1625_v44, %v1204_v43  ;;  %v1180_v49 = vld [vmem:[#allocation5 + $0x20] sm:$0xf]  ;;  %v1620_v51 = vld [vmem:[#allocation5 + $0x2c] sm:$0xf0] }
  0x28   :  { %v1201_v50 = vor.u32 %v1622_v45, %v1198_v46  ;;  %v1188_v52 = vld [vmem:[#allocation5 + $0x28] sm:$0xf]  ;;  %v1621_v53 = vld [vmem:[#allocation5 + $0x34] sm:$0xf0]  ;;  %v1618_v55 = vld [vmem:[#allocation5 + $0x24] sm:$0xf]  ;;  %v1181_v57 = vor.u32 %v1620_v51, %v1180_v49 }
  0x29   :  { %317 = vmatpush.bf16.msra.mxu3 %v1245_v20  ;;  %345 = vmatpush.bf16.msra.mxu2 %v1253_v21  ;;  %v1182_v56 = vld [vmem:[#allocation5 + $0x30] sm:$0xf0]  ;;  %v1189_v58 = vor.u32 %v1621_v53, %v1188_v52  ;;  %v1164_v59 = vld [vmem:[#allocation5] sm:$0xf]  ;;  %v1616_v61 = vld [vmem:[#allocation5 + $0xc] sm:$0xf0] }
  0x2a   :  { %331 = vmatpush.bf16.msra.mxu1 %v1249_v23  ;;  %v1185_v60 = vor.u32 %v1618_v55, %v1182_v56  ;;  %v1172_v62 = vld [vmem:[#allocation5 + $0x8] sm:$0xf]  ;;  %v1617_v63 = vld [vmem:[#allocation5 + $0x14] sm:$0xf0]  ;;  %v1614_v1 = vld [vmem:[#allocation5 + $0x4] sm:$0xf]  ;;  %v1165_v3 = vor.u32 %v1616_v61, %v1164_v59 }
  0x2b   :  { %v1166_v2 = vld [vmem:[#allocation5 + $0x10] sm:$0xf0]  ;;  %v127_v5 = vld [vmem:[#allocation2 + $0x8] sm:$0xff]  ;;  %v1173_v6 = vor.u32 %v1617_v63, %v1172_v62  ;;  %v1635_v8 = vld [vmem:[#allocation5 + $0xac] sm:$0xf]  ;;  %s1146_s25 = sshll.u32 %s2063_s9, 4  ;;  %s1147_s25 = int_to_ptr.hbm [resolvable:$true] %s1146_s25 }
  0x2c   :  { %v126_v4 = vld [vmem:[#allocation2] sm:$0xff]  ;;  %v1384_v9 = vld [vmem:[#allocation8 + $0xf0] sm:$0xf]  ;;  %v1669_v10 = vld [vmem:[#allocation8 + $0xf4] sm:$0xf0]  ;;  %v1169_v11 = vor.u32 %v1614_v1, %v1166_v2 }
  0x2d   :  { %318 = vmatpush.bf16.msra.mxu3 %v1229_v29  ;;  %346 = vmatpush.bf16.msra.mxu2 %v1237_v30  ;;  %v1254_v13 = vld [vmem:[#allocation5 + $0xb8] sm:$0xf0]  ;;  %v1320_v14 = vld [vmem:[#allocation8 + $0x70] sm:$0xf]  ;;  %v1653_v15 = vld [vmem:[#allocation8 + $0x74] sm:$0xf0]  ;;  %v1385_v16 = vor.u32 %v1669_v10, %v1384_v9  ;;  %v2023_v21 = vpack.c.bf16 %v127_v5, %v126_v4 }
  0x2e   :  { %332 = vmatpush.bf16.msra.mxu1 %v1233_v32  ;;  %v1376_v17 = vld [vmem:[#allocation8 + $0xe0] sm:$0xf]  ;;  %v1321_v18 = vor.u32 %v1653_v15, %v1320_v14  ;;  %v1448_v19 = vld [vmem:[#allocation8 + $0x170] sm:$0xf]  ;;  %v1685_v20 = vld [vmem:[#allocation8 + $0x174] sm:$0xf0]  ;;  %v1257_v7 = vor.u32 %v1635_v8, %v1254_v13 }
  0x2f   :  { %v1667_v22 = vld [vmem:[#allocation8 + $0xe4] sm:$0xf0]  ;;  %v1312_v23 = vld [vmem:[#allocation8 + $0x60] sm:$0xf]  ;;  %v1449_v25 = vor.u32 %v1685_v20, %v1448_v19  ;;  %v1631_v28 = vld [vmem:[#allocation5 + $0x8c] sm:$0xf] }
  0x30   :  { %v1651_v24 = vld [vmem:[#allocation8 + $0x64] sm:$0xf0]  ;;  %v1440_v26 = vld [vmem:[#allocation8 + $0x160] sm:$0xf]  ;;  %v1377_v30 = vor.u32 %v1667_v22, %v1376_v17  ;;  %773 = vmatpush.bf16.msra.mxu0 %v1321_v18  ;;  %v1368_v31 = vld [vmem:[#allocation8 + $0xd0] sm:$0xf] }
  0x31   :  { %319 = vmatpush.bf16.msra.mxu3 %v1213_v38  ;;  %347 = vmatpush.bf16.msra.mxu2 %v1221_v39  ;;  %v1683_v27 = vld [vmem:[#allocation8 + $0x164] sm:$0xf0]  ;;  %v1313_v32 = vor.u32 %v1651_v24, %v1312_v23  ;;  %v1665_v33 = vld [vmem:[#allocation8 + $0xd4] sm:$0xf0]  ;;  %v1304_v34 = vld [vmem:[#allocation8 + $0x50] sm:$0xf] }
  0x32   :  { %333 = vmatpush.bf16.msra.mxu1 %v1217_v42  ;;  %v1238_v29 = vld [vmem:[#allocation5 + $0x98] sm:$0xf0]  ;;  %v1649_v35 = vld [vmem:[#allocation8 + $0x54] sm:$0xf0]  ;;  %v1441_v36 = vor.u32 %v1683_v27, %v1440_v26  ;;  %v1432_v38 = vld [vmem:[#allocation8 + $0x150] sm:$0xf]  ;;  %v1369_v42 = vor.u32 %v1665_v33, %v1368_v31 }
  0x33   :  { %v1241_v37 = vor.u32 %v1631_v28, %v1238_v29  ;;  %v1681_v39 = vld [vmem:[#allocation8 + $0x154] sm:$0xf0]  ;;  %v1222_v41 = vld [vmem:[#allocation5 + $0x78] sm:$0xf0]  ;;  %v1360_v43 = vld [vmem:[#allocation8 + $0xc0] sm:$0xf]  ;;  %v1305_v44 = vor.u32 %v1649_v35, %v1304_v34 }
  0x34   :  { %v1627_v40 = vld [vmem:[#allocation5 + $0x6c] sm:$0xf]  ;;  %774 = vmatpush.bf16.msra.mxu0 %v1313_v32  ;;  %v1663_v45 = vld [vmem:[#allocation8 + $0xc4] sm:$0xf0]  ;;  %v1296_v46 = vld [vmem:[#allocation8 + $0x40] sm:$0xf] }
  0x35   :  { %320 = vmatpush.bf16.msra.mxu3 %v1197_v47  ;;  %348 = vmatpush.bf16.msra.mxu2 %v1205_v48  ;;  %v1647_v47 = vld [vmem:[#allocation8 + $0x44] sm:$0xf0]  ;;  %v1433_v48 = vor.u32 %v1681_v39, %v1432_v38  ;;  %v1225_v49 = vor.u32 %v1627_v40, %v1222_v41  ;;  %v1623_v52 = vld [vmem:[#allocation5 + $0x4c] sm:$0xf]  ;;  %v1361_v54 = vor.u32 %v1663_v45, %v1360_v43  ;;  %v1352_v55 = vld [vmem:[#allocation8 + $0xb0] sm:$0xf] }
  0x36   :  { %334 = vmatpush.bf16.msra.mxu1 %v1201_v50  ;;  %v1424_v50 = vld [vmem:[#allocation8 + $0x140] sm:$0xf]  ;;  %v1679_v51 = vld [vmem:[#allocation8 + $0x144] sm:$0xf0]  ;;  %v1297_v56 = vor.u32 %v1647_v47, %v1296_v46  ;;  %v1645_v59 = vld [vmem:[#allocation8 + $0x34] sm:$0xf0] }
  0x37   :  { %v1206_v53 = vld [vmem:[#allocation5 + $0x58] sm:$0xf0]  ;;  %v1416_v62 = vld [vmem:[#allocation8 + $0x130] sm:$0xf]  ;;  %v1677_v63 = vld [vmem:[#allocation8 + $0x134] sm:$0xf0] }
  0x38   :  { %775 = vmatpush.bf16.msra.mxu0 %v1305_v44  ;;  %v1209_v61 = vor.u32 %v1623_v52, %v1206_v53  ;;  %v1619_v0 = vld [vmem:[#allocation5 + $0x2c] sm:$0xf]  ;;  %v1190_v1 = vld [vmem:[#allocation5 + $0x38] sm:$0xf0]  ;;  %v1344_v4 = vld [vmem:[#allocation8 + $0xa0] sm:$0xf]  ;;  %v1417_v9 = vor.u32 %v1677_v63, %v1416_v62 }
  0x39   :  { %321 = vmatpush.bf16.msra.mxu3 %v1181_v57  ;;  %349 = vmatpush.bf16.msra.mxu2 %v1189_v58  ;;  %v1661_v57 = vld [vmem:[#allocation8 + $0xb4] sm:$0xf0]  ;;  %v1288_v58 = vld [vmem:[#allocation8 + $0x30] sm:$0xf]  ;;  %v1643_v8 = vld [vmem:[#allocation8 + $0x24] sm:$0xf0]  ;;  %v1193_v10 = vor.u32 %v1619_v0, %v1190_v1 }
  0x3a   :  { %335 = vmatpush.bf16.msra.mxu1 %v1185_v60  ;;  %v1425_v60 = vor.u32 %v1679_v51, %v1424_v50  ;;  %v1353_v2 = vor.u32 %v1661_v57, %v1352_v55  ;;  %v1289_v5 = vor.u32 %v1645_v59, %v1288_v58  ;;  %v1615_v13 = vld [vmem:[#allocation5 + $0xc] sm:$0xf]  ;;  %v1174_v14 = vld [vmem:[#allocation5 + $0x18] sm:$0xf0]  ;;  %v1336_v17 = vld [vmem:[#allocation8 + $0x90] sm:$0xf] }
  0x3b   :  { %v1657_v18 = vld [vmem:[#allocation8 + $0x94] sm:$0xf0]  ;;  %v1177_v20 = vor.u32 %v1615_v13, %v1174_v14  ;;  %v1328_v23 = vld [vmem:[#allocation8 + $0x80] sm:$0xf]  ;;  %v1655_v24 = vld [vmem:[#allocation8 + $0x84] sm:$0xf0] }
  0x3c   :  { %776 = vmatpush.bf16.msra.mxu0 %v1297_v56  ;;  %v1337_v22 = vor.u32 %v1657_v18, %v1336_v17  ;;  %v1641_v26 = vld [vmem:[#allocation8 + $0x14] sm:$0xf0]  ;;  %v1400_v27 = vld [vmem:[#allocation8 + $0x110] sm:$0xf]  ;;  %v1386_v31 = vld [vmem:[#allocation8 + $0xf8] sm:$0xf0] }
  0x3d   :  { %322 = vmatpush.bf16.msra.mxu3 %v1165_v3  ;;  %350 = vmatpush.bf16.msra.mxu2 %v1173_v6  ;;  %v1659_v3 = vld [vmem:[#allocation8 + $0xa4] sm:$0xf0]  ;;  %v1280_v6 = vld [vmem:[#allocation8 + $0x20] sm:$0xf]  ;;  %v1673_v29 = vld [vmem:[#allocation8 + $0x114] sm:$0xf0] }
  0x3e   :  { %336 = vmatpush.bf16.msra.mxu1 %v1169_v11  ;;  %v1408_v11 = vld [vmem:[#allocation8 + $0x120] sm:$0xf]  ;;  %v1345_v15 = vor.u32 %v1659_v3, %v1344_v4  ;;  %v1401_v32 = vor.u32 %v1673_v29, %v1400_v27  ;;  %v1512_v34 = vld [vmem:[#allocation8 + $0x1f0] sm:$0xf]  ;;  %v1701_v35 = vld [vmem:[#allocation8 + $0x1f4] sm:$0xf0] }
  0x3f   :  { %v1639_v38 = vld [vmem:[#allocation8 + $0x4] sm:$0xf0]  ;;  %v1392_v39 = vld [vmem:[#allocation8 + $0x100] sm:$0xf]  ;;  %v1666_v41 = vld [vmem:[#allocation8 + $0xe4] sm:$0xf] }
  0x40   :  { %1258 = vmatmul.msk.bf16.vlgmr.msra.gmra.mxu3 %vm295_vm2, %v2023_v21  ;;  %1260 = vmatmul.msk.bf16.vlgmr.msra.gmra.mxu2 %vm295_vm2, %v2023_v21  ;;  %v1671_v40 = vld [vmem:[#allocation8 + $0x104] sm:$0xf0]  ;;  %v1504_v45 = vld [vmem:[#allocation8 + $0x1e0] sm:$0xf]  ;;  %v1684_v50 = vld [vmem:[#allocation8 + $0x174] sm:$0xf] }
  0x41   :  { %358 = vmatpush.bf16.msrb.mxu3 %v313_v12  ;;  %1259 = vmatmul.msk.bf16.vlgmr.msra.gmra.mxu1 %vm295_vm2, %v2023_v21  ;;  %v1675_v12 = vld [vmem:[#allocation8 + $0x124] sm:$0xf0]  ;;  %v1393_v43 = vor.u32 %v1671_v40, %v1392_v39  ;;  %v1450_v52 = vld [vmem:[#allocation8 + $0x178] sm:$0xf0]  ;;  %v1664_v53 = vld [vmem:[#allocation8 + $0xd4] sm:$0xf] }
  0x42   :  { %787 = vmatpush.bf16.msrb.mxu1 %v1385_v16  ;;  %801 = vmatpush.bf16.msrb.mxu2 %v1449_v25  ;;  %v1281_v16 = vor.u32 %v1643_v8, %v1280_v6  ;;  %v1409_v19 = vor.u32 %v1675_v12, %v1408_v11  ;;  %v1329_v25 = vor.u32 %v1655_v24, %v1328_v23  ;;  %v1699_v46 = vld [vmem:[#allocation8 + $0x1e4] sm:$0xf0]  ;;  %v1496_v57 = vld [vmem:[#allocation8 + $0x1d0] sm:$0xf]  ;;  %v1697_v58 = vld [vmem:[#allocation8 + $0x1d4] sm:$0xf0] }
  0x43   :  { %777 = vmatpush.bf16.msra.mxu0 %v1289_v5  ;;  %v1505_v47 = vor.u32 %v1699_v46, %v1504_v45  ;;  %v1453_v55 = vor.u32 %v1684_v50, %v1450_v52  ;;  %v1650_v59 = vld [vmem:[#allocation8 + $0x64] sm:$0xf]  ;;  %v1442_v63 = vld [vmem:[#allocation8 + $0x168] sm:$0xf0]  ;;  %v1488_v3 = vld [vmem:[#allocation8 + $0x1c0] sm:$0xf] }
  0x44   :  { %v1682_v62 = vld [vmem:[#allocation8 + $0x164] sm:$0xf]  ;;  %v1362_v4 = vld [vmem:[#allocation8 + $0xc8] sm:$0xf0]  ;;  %v1695_v6 = vld [vmem:[#allocation8 + $0x1c4] sm:$0xf0] }
  0x45   :  { %359 = vmatpush.bf16.msrb.mxu3 %v1257_v7  ;;  %v1272_v7 = vld [vmem:[#allocation8 + $0x10] sm:$0xf]  ;;  %v1445_v1 = vor.u32 %v1682_v62, %v1442_v63  ;;  %v1648_v8 = vld [vmem:[#allocation8 + $0x54] sm:$0xf]  ;;  %v1434_v12 = vld [vmem:[#allocation8 + $0x158] sm:$0xf0] }
  0x46   :  { %788 = vmatpush.bf16.msrb.mxu1 %v1377_v30  ;;  %802 = vmatpush.bf16.msrb.mxu2 %v1441_v36  ;;  %v1273_v28 = vor.u32 %v1641_v26, %v1272_v7  ;;  %v1668_v30 = vld [vmem:[#allocation8 + $0xf4] sm:$0xf]  ;;  %v1513_v36 = vor.u32 %v1701_v35, %v1512_v34  ;;  %v1480_v18 = vld [vmem:[#allocation8 + $0x1b0] sm:$0xf]  ;;  %v1298_v23 = vld [vmem:[#allocation8 + $0x48] sm:$0xf0] }
  0x47   :  { %778 = vmatpush.bf16.msra.mxu0 %v1281_v16  ;;  %v1389_v33 = vor.u32 %v1668_v30, %v1386_v31  ;;  %v1680_v11 = vld [vmem:[#allocation8 + $0x154] sm:$0xf]  ;;  %v1354_v16 = vld [vmem:[#allocation8 + $0xb8] sm:$0xf0]  ;;  %v1678_v24 = vld [vmem:[#allocation8 + $0x144] sm:$0xf] }
  0x48   :  { %v1437_v14 = vor.u32 %v1680_v11, %v1434_v12  ;;  %v1658_v27 = vld [vmem:[#allocation8 + $0xa4] sm:$0xf]  ;;  %v1472_v30 = vld [vmem:[#allocation8 + $0x1a0] sm:$0xf]  ;;  %v1691_v31 = vld [vmem:[#allocation8 + $0x1a4] sm:$0xf0] }
  0x49   :  { %360 = vmatpush.bf16.msrb.mxu3 %v1241_v37  ;;  %v1264_v37 = vld [vmem:[#allocation8] sm:$0xf]  ;;  %v1290_v34 = vld [vmem:[#allocation8 + $0x38] sm:$0xf0]  ;;  %v1676_v35 = vld [vmem:[#allocation8 + $0x134] sm:$0xf] }
  0x4a   :  { %789 = vmatpush.bf16.msrb.mxu1 %v1369_v42  ;;  %803 = vmatpush.bf16.msrb.mxu2 %v1433_v48  ;;  %v1378_v42 = vld [vmem:[#allocation8 + $0xe8] sm:$0xf0]  ;;  %v1652_v48 = vld [vmem:[#allocation8 + $0x74] sm:$0xf]  ;;  %v1464_v40 = vld [vmem:[#allocation8 + $0x190] sm:$0xf] }
  0x4b   :  { %779 = vmatpush.bf16.msra.mxu0 %v1273_v28  ;;  %v1381_v44 = vor.u32 %v1666_v41, %v1378_v42  ;;  %v1346_v28 = vld [vmem:[#allocation8 + $0xa8] sm:$0xf0]  ;;  %v1656_v39 = vld [vmem:[#allocation8 + $0x94] sm:$0xf]  ;;  %v1689_v42 = vld [vmem:[#allocation8 + $0x194] sm:$0xf0] }
  0x4c   :  { %v1349_v29 = vor.u32 %v1658_v27, %v1346_v28  ;;  %v1465_v45 = vor.u32 %v1689_v42, %v1464_v40  ;;  %v1674_v46 = vld [vmem:[#allocation8 + $0x124] sm:$0xf]  ;;  %v1330_v50 = vld [vmem:[#allocation8 + $0x88] sm:$0xf0]  ;;  %v1687_v52 = vld [vmem:[#allocation8 + $0x184] sm:$0xf0] }
  0x4d   :  { %361 = vmatpush.bf16.msrb.mxu3 %v1225_v49  ;;  %v1322_v49 = vld [vmem:[#allocation8 + $0x78] sm:$0xf0] }
  0x4e   :  { %790 = vmatpush.bf16.msrb.mxu1 %v1361_v54  ;;  %804 = vmatpush.bf16.msrb.mxu2 %v1425_v60  ;;  %v1325_v51 = vor.u32 %v1652_v48, %v1322_v49  ;;  %v1370_v54 = vld [vmem:[#allocation8 + $0xd8] sm:$0xf0]  ;;  %v1497_v60 = vor.u32 %v1697_v58, %v1496_v57  ;;  %v1654_v48 = vld [vmem:[#allocation8 + $0x84] sm:$0xf]  ;;  %v1672_v57 = vld [vmem:[#allocation8 + $0x114] sm:$0xf] }
  0x4f   :  { %v1373_v56 = vor.u32 %v1664_v53, %v1370_v54  ;;  %v1640_v54 = vld [vmem:[#allocation8 + $0x14] sm:$0xf]  ;;  %v1402_v58 = vld [vmem:[#allocation8 + $0x118] sm:$0xf0] }
  0x50   :  { %v1514_v62 = vld [vmem:[#allocation8 + $0x1f8] sm:$0xf0]  ;;  %v1405_v63 = vor.u32 %v1672_v57, %v1402_v58 }
  0x51   :  { %362 = vmatpush.bf16.msrb.mxu3 %v1209_v61  ;;  %v1314_v61 = vld [vmem:[#allocation8 + $0x68] sm:$0xf0] }
  0x52   :  { %791 = vmatpush.bf16.msrb.mxu1 %v1353_v2  ;;  %805 = vmatpush.bf16.msrb.mxu2 %v1417_v9  ;;  %v1317_v0 = vor.u32 %v1650_v59, %v1314_v61  ;;  %v1662_v2 = vld [vmem:[#allocation8 + $0xc4] sm:$0xf]  ;;  %v1489_v9 = vor.u32 %v1695_v6, %v1488_v3  ;;  %v1700_v61 = vld [vmem:[#allocation8 + $0x1f4] sm:$0xf]  ;;  %v1394_v6 = vld [vmem:[#allocation8 + $0x108] sm:$0xf0] }
  0x53   :  { %v1365_v5 = vor.u32 %v1662_v2, %v1362_v4  ;;  %v1638_v2 = vld [vmem:[#allocation8 + $0x4] sm:$0xf]  ;;  %v1266_v4 = vld [vmem:[#allocation8 + $0x8] sm:$0xf0] }
  0x54   :  { %v1269_v3 = vor.u32 %v1638_v2, %v1266_v4  ;;  %v1705_v2 = vld [vmem:[#allocation10 + $0x18] sm:$0xff]  ;;  %v1704_v4 = vld [vmem:[#allocation10 + $0x10] sm:$0xff] }
  0x55   :  { %363 = vmatpush.bf16.msrb.mxu3 %v1193_v10  ;;  %v1306_v10 = vld [vmem:[#allocation8 + $0x58] sm:$0xf0] }
  0x56   :  { %792 = vmatpush.bf16.msrb.mxu1 %v1345_v15  ;;  %806 = vmatpush.bf16.msrb.mxu2 %v1409_v19  ;;  %v1309_v13 = vor.u32 %v1648_v8, %v1306_v10  ;;  %v1660_v15 = vld [vmem:[#allocation8 + $0xb4] sm:$0xf]  ;;  %v1693_v19 = vld [vmem:[#allocation8 + $0x1b4] sm:$0xf0]  ;;  %v1698_v8 = vld [vmem:[#allocation8 + $0x1e4] sm:$0xf] }
  0x57   :  { %v1357_v17 = vor.u32 %v1660_v15, %v1354_v16  ;;  %v1498_v15 = vld [vmem:[#allocation8 + $0x1d8] sm:$0xf0] }
  0x59   :  { %364 = vmatpush.bf16.msrb.mxu3 %v1177_v20  ;;  %v1646_v20 = vld [vmem:[#allocation8 + $0x44] sm:$0xf] }
  0x5a   :  { %793 = vmatpush.bf16.msrb.mxu1 %v1337_v22  ;;  %807 = vmatpush.bf16.msrb.mxu2 %v1401_v32  ;;  %v1481_v22 = vor.u32 %v1693_v19, %v1480_v18  ;;  %v1301_v7 = vor.u32 %v1646_v20, %v1298_v23  ;;  %v1644_v32 = vld [vmem:[#allocation8 + $0x34] sm:$0xf]  ;;  %v1694_v23 = vld [vmem:[#allocation8 + $0x1c4] sm:$0xf] }
  0x5c   :  { %1261 = vmatmul.msk.bf16.vlgmr.msrb.gmra.mxu3 %vm295_vm2, %v2023_v21  ;;  %v1265_v21 = vor.u32 %v1639_v38, %v1264_v37  ;;  %v1293_v37 = vor.u32 %v1644_v32, %v1290_v34  ;;  %v1482_v32 = vld [vmem:[#allocation8 + $0x1b8] sm:$0xf0] }
  0x5d   :  { %815 = vmatpush.bf16.msra.mxu3 %v1513_v36  ;;  %v1418_v36 = vld [vmem:[#allocation8 + $0x138] sm:$0xf0] }
  0x5e   :  { %794 = vmatpush.bf16.msrb.mxu1 %v1329_v25  ;;  %780 = vmatpush.bf16.msra.mxu0 %v1265_v21  ;;  %v1426_v25 = vld [vmem:[#allocation8 + $0x148] sm:$0xf0]  ;;  %v1421_v38 = vor.u32 %v1676_v35, %v1418_v36  ;;  %v1338_v21 = vld [vmem:[#allocation8 + $0x98] sm:$0xf0] }
  0x5f   :  { %808 = vmatpush.bf16.msrb.mxu2 %v1393_v43  ;;  %v1429_v26 = vor.u32 %v1678_v24, %v1426_v25  ;;  %v1341_v41 = vor.u32 %v1656_v39, %v1338_v21  ;;  %v1642_v43 = vld [vmem:[#allocation8 + $0x24] sm:$0xf]  ;;  %v1490_v24 = vld [vmem:[#allocation8 + $0x1c8] sm:$0xf0] }
  0x61   :  { %816 = vmatpush.bf16.msra.mxu3 %v1505_v47  ;;  %v1410_v47 = vld [vmem:[#allocation8 + $0x128] sm:$0xf0] }
  0x62   :  { %843 = vmatpush.bf16.msra.mxu1 %v1389_v33  ;;  %829 = vmatpush.bf16.msrb.mxu0 %v1325_v51  ;;  %v1473_v33 = vor.u32 %v1691_v31, %v1472_v30  ;;  %v1456_v51 = vld [vmem:[#allocation8 + $0x180] sm:$0xf]  ;;  %v1413_v53 = vor.u32 %v1674_v46, %v1410_v47  ;;  %v1692_v31 = vld [vmem:[#allocation8 + $0x1b4] sm:$0xf]  ;;  %v1466_v46 = vld [vmem:[#allocation8 + $0x198] sm:$0xf0] }
  0x63   :  { %857 = vmatpush.bf16.msra.mxu2 %v1453_v55  ;;  %v1274_v55 = vld [vmem:[#allocation8 + $0x18] sm:$0xf0]  ;;  %v1457_v59 = vor.u32 %v1687_v52, %v1456_v51  ;;  %v1458_v51 = vld [vmem:[#allocation8 + $0x188] sm:$0xf0] }
  0x65   :  { %817 = vmatpush.bf16.msra.mxu3 %v1497_v60  ;;  %v1277_v60 = vor.u32 %v1640_v54, %v1274_v55 }
  0x66   :  { %844 = vmatpush.bf16.msra.mxu1 %v1381_v44  ;;  %830 = vmatpush.bf16.msrb.mxu0 %v1317_v0  ;;  %v1282_v44 = vld [vmem:[#allocation8 + $0x28] sm:$0xf0]  ;;  %v1517_v0 = vor.u32 %v1700_v61, %v1514_v62  ;;  %v1709_v61 = vld [vmem:[#allocation10 + $0x38] sm:$0xff]  ;;  %v1708_v62 = vld [vmem:[#allocation10 + $0x30] sm:$0xff] }
  0x67   :  { %858 = vmatpush.bf16.msra.mxu2 %v1445_v1  ;;  %v1285_v49 = vor.u32 %v1642_v43, %v1282_v44  ;;  %v2033_v1 = vld [vmem:[#allocation7] sm:$0xf] }
  0x68   :  { %v157_v20 = vperm.slane %v2033_v1, 0  ;;  %v160_v54 = vperm.slane %v2033_v1, 3 }
  0x69   :  { %818 = vmatpush.bf16.msra.mxu3 %v1489_v9  ;;  %v1506_v9 = vld [vmem:[#allocation8 + $0x1e8] sm:$0xf0] }
  0x6a   :  { %845 = vmatpush.bf16.msra.mxu1 %v1373_v56  ;;  %831 = vmatpush.bf16.msrb.mxu0 %v1309_v13  ;;  %v1333_v56 = vor.u32 %v1654_v48, %v1330_v50  ;;  %v1509_v12 = vor.u32 %v1698_v8, %v1506_v9  ;;  %v158_v13 = vperm.slane %v2033_v1, 1  ;;  %v1686_v50 = vld [vmem:[#allocation8 + $0x184] sm:$0xf] }
  0x6b   :  { %859 = vmatpush.bf16.msra.mxu2 %v1437_v14  ;;  %v1696_v14 = vld [vmem:[#allocation8 + $0x1d4] sm:$0xf]  ;;  %v1461_v52 = vor.u32 %v1686_v50, %v1458_v51  ;;  %v1702_v8 = vld [vmem:[#allocation10] sm:$0xff] }
  0x6c   :  { %v1501_v16 = vor.u32 %v1696_v14, %v1498_v15  ;;  %v1714_v9 = vld [vmem:[#allocation10 + $0x60] sm:$0xff]  ;;  %v447_v14 = vld [vmem:[%s2058_s4] sm:$0x3] }
  0x6d   :  { %819 = vmatpush.bf16.msra.mxu3 %v1481_v22  ;;  %v159_v22 = vperm.slane %v2033_v1, 2  ;;  %v1717_v1 = vld [vmem:[#allocation10 + $0x78] sm:$0xff] }
  0x6e   :  { %846 = vmatpush.bf16.msra.mxu1 %v1365_v5  ;;  %832 = vmatpush.bf16.msrb.mxu0 %v1301_v7  ;;  %v1670_v5 = vld [vmem:[#allocation8 + $0x104] sm:$0xf]  ;;  %v1493_v7 = vor.u32 %v1694_v23, %v1490_v24 }
  0x6f   :  { %860 = vmatpush.bf16.msra.mxu2 %v1429_v26  ;;  %v1397_v11 = vor.u32 %v1670_v5, %v1394_v6  ;;  %v1716_v5 = vld [vmem:[#allocation10 + $0x70] sm:$0xff]  ;;  %v1715_v6 = vld [vmem:[#allocation10 + $0x68] sm:$0xff] }
  0x71   :  { %820 = vmatpush.bf16.msra.mxu3 %v1473_v33  ;;  %v1485_v33 = vor.u32 %v1692_v31, %v1482_v32 }
  0x72   :  { %847 = vmatpush.bf16.msra.mxu1 %v1357_v17  ;;  %833 = vmatpush.bf16.msrb.mxu0 %v1293_v37  ;;  %v1690_v37 = vld [vmem:[#allocation8 + $0x1a4] sm:$0xf] }
  0x73   :  { %861 = vmatpush.bf16.msra.mxu2 %v1421_v38  ;;  %v1474_v38 = vld [vmem:[#allocation8 + $0x1a8] sm:$0xf0] }
  0x74   :  { %v1477_v42 = vor.u32 %v1690_v37, %v1474_v38 }
  0x75   :  { %821 = vmatpush.bf16.msra.mxu3 %v1465_v45  ;;  %v1688_v45 = vld [vmem:[#allocation8 + $0x194] sm:$0xf] }
  0x76   :  { %848 = vmatpush.bf16.msra.mxu1 %v1349_v29  ;;  %834 = vmatpush.bf16.msrb.mxu0 %v1285_v49  ;;  %v1469_v49 = vor.u32 %v1688_v45, %v1466_v46 }
  0x77   :  { %862 = vmatpush.bf16.msra.mxu2 %v1413_v53 }
  0x79   :  { %822 = vmatpush.bf16.msra.mxu3 %v1457_v59 }
  0x7a   :  { %849 = vmatpush.bf16.msra.mxu1 %v1341_v41  ;;  %835 = vmatpush.bf16.msrb.mxu0 %v1277_v60 }
  0x7b   :  { %863 = vmatpush.bf16.msra.mxu2 %v1405_v63  ;;  %v1707_v63 = vld [vmem:[#allocation10 + $0x28] sm:$0xff] }
  0x7d   :  { %871 = vmatpush.bf16.msrb.mxu3 %v1517_v0  ;;  %v1706_v0 = vld [vmem:[#allocation10 + $0x20] sm:$0xff] }
  0x7e   :  { %850 = vmatpush.bf16.msra.mxu1 %v1333_v56  ;;  %836 = vmatpush.bf16.msrb.mxu0 %v1269_v3  ;;  %v1703_v3 = vld [vmem:[#allocation10 + $0x8] sm:$0xff] }
  0x7f   :  { %864 = vmatpush.bf16.msra.mxu2 %v1397_v11 }
  0x81   :  { %872 = vmatpush.bf16.msrb.mxu3 %v1509_v12  ;;  %v1712_v12 = vld [vmem:[#allocation10 + $0x50] sm:$0xff] }
  0x85   :  { %873 = vmatpush.bf16.msrb.mxu3 %v1501_v16  ;;  %v1711_v16 = vld [vmem:[#allocation10 + $0x48] sm:$0xff] }
  0x89   :  { %874 = vmatpush.bf16.msrb.mxu3 %v1493_v7 }
  0x8d   :  { %875 = vmatpush.bf16.msrb.mxu3 %v1485_v33 }
  0x91   :  { %876 = vmatpush.bf16.msrb.mxu3 %v1477_v42 }
  0x95   :  { %877 = vmatpush.bf16.msrb.mxu3 %v1469_v49 }
  0x99   :  { %878 = vmatpush.bf16.msrb.mxu3 %v1461_v52 }
  0xbe   :  { %v338_v10 = vpop.f32.mrf.mxu1 }
  0xbf   :  { %v339_v17 = vadd.f32 %v338_v10, %v158_v13  ;;  %v1713_v10 = vld [vmem:[#allocation10 + $0x58] sm:$0xff] }
  0xc1   :  { %v372_v26 = vmax.f32 %v339_v17, 0.0  ;;  %v449_v17 = vperm.slane %v447_v14, 0 }
  0xc3   :  { %v324_v18 = vpop.f32.mrf.mxu3  ;;  %v352_v19 = vpop.f32.mrf.mxu2 }
  0xc4   :  { %v325_v28 = vadd.f32 %v324_v18, %v157_v20  ;;  %v353_v29 = vadd.f32 %v352_v19, %v159_v22  ;;  %v1710_v19 = vld [vmem:[#allocation10 + $0x40] sm:$0xff] }
  0xc6   :  { %v340_v25 = vpop.f32.mrf.mxu1  ;;  %v371_v39 = vmax.f32 %v325_v28, 0.0  ;;  %v373_v21 = vmax.f32 %v353_v29, 0.0 }
  0xc7   :  { %v341_v27 = vadd.f32 %v340_v25, %v158_v13 }
  0xc9   :  { %v376_v30 = vmax.f32 %v341_v27, 0.0 }
  0xcb   :  { %v380_v34 = vpack.c.bf16 %v376_v30, %v372_v26  ;;  %v326_v35 = vpop.f32.mrf.mxu3  ;;  %v354_v36 = vpop.f32.mrf.mxu2 }
  0xcc   :  { %v327_v40 = vadd.f32 %v326_v35, %v157_v20  ;;  %v355_v41 = vadd.f32 %v354_v36, %v159_v22  ;;  %v450_v35 = vperm.slane %v447_v14, 1 }
  0xcd   :  { %795 = vmatmul.bf16.vlgmr.msrb.gmra.mxu1 %v380_v34 }
  0xce   :  { %v375_v43 = vmax.f32 %v327_v40, 0.0  ;;  %v377_v44 = vmax.f32 %v355_v41, 0.0  ;;  %1037 = vmatpush.bf16.msrb.mxu1 %v1717_v1 }
  0xd0   :  { %v381_v47 = vpack.c.bf16 %v377_v44, %v373_v21  ;;  %v379_v48 = vpack.c.bf16 %v375_v43, %v371_v39 }
  0xd2   :  { %781 = vmatmul.bf16.vlgmr.msra.gmra.mxu0 %v379_v48  ;;  %809 = vmatmul.bf16.vlgmr.msrb.gmra.mxu2 %v381_v47 }
  0xd3   :  { %1023 = vmatpush.bf16.msra.mxu0 %v1709_v61  ;;  %1038 = vmatpush.bf16.msrb.mxu1 %v1716_v5  ;;  %v1718_v61 = vld [vmem:[#allocation11] sm:$0xff] }
  0xd7   :  { %1024 = vmatpush.bf16.msra.mxu0 %v1708_v62  ;;  %1039 = vmatpush.bf16.msrb.mxu1 %v1715_v6 }
  0xdb   :  { %1025 = vmatpush.bf16.msra.mxu0 %v1707_v63  ;;  %1040 = vmatpush.bf16.msrb.mxu1 %v1714_v9 }
  0xdd   :  { %851 = vmatmul.bf16.vlgmr.msra.gmra.mxu1 %v380_v34 }
  0xdf   :  { %v366_v53 = vpop.f32.mrf.mxu3  ;;  %1026 = vmatpush.bf16.msra.mxu0 %v1706_v0  ;;  %1041 = vmatpush.bf16.msrb.mxu1 %v1713_v10  ;;  %v1745_v0 = vld [vmem:[%s2060_s6] ss:$0 sm:$0xff] }
  0xe0   :  { %v367_v55 = vadd.f32 %v366_v53, %v160_v54 }
  0xe2   :  { %837 = vmatmul.bf16.vlgmr.msrb.gmra.mxu0 %v379_v48  ;;  %865 = vmatmul.bf16.vlgmr.msra.gmra.mxu2 %v381_v47  ;;  %v374_v58 = vmax.f32 %v367_v55, 0.0  ;;  %v1724_v55 = vld [vmem:[#allocation11 + $0x30] sm:$0xff] }
  0xe3   :  { %1027 = vmatpush.bf16.msra.mxu0 %v1705_v2  ;;  %1042 = vmatpush.bf16.msrb.mxu1 %v1712_v12  ;;  %v1746_v12 = vld [vmem:[%s2062_s8] ss:$0 sm:$0xff] }
  0xe7   :  { %v368_v56 = vpop.f32.mrf.mxu3  ;;  %1028 = vmatpush.bf16.msra.mxu0 %v1704_v4  ;;  %1043 = vmatpush.bf16.msrb.mxu1 %v1711_v16 }
  0xe8   :  { %v369_v57 = vadd.f32 %v368_v56, %v160_v54  ;;  %v1725_v54 = vld [vmem:[#allocation11 + $0x38] sm:$0xff]  ;;  %v1723_v56 = vld [vmem:[#allocation11 + $0x28] sm:$0xff] }
  0xe9   :  { %1122 = vmatpush.bf16.msrb.mxu2 %v1725_v54 }
  0xea   :  { %v378_v59 = vmax.f32 %v369_v57, 0.0  ;;  %v1722_v57 = vld [vmem:[#allocation11 + $0x20] sm:$0xff] }
  0xeb   :  { %1029 = vmatpush.bf16.msra.mxu0 %v1703_v3  ;;  %1044 = vmatpush.bf16.msrb.mxu1 %v1710_v19 }
  0xec   :  { %v382_v60 = vpack.c.bf16 %v378_v59, %v374_v58  ;;  %v1721_v58 = vld [vmem:[#allocation11 + $0x18] sm:$0xff]  ;;  %v1720_v59 = vld [vmem:[#allocation11 + $0x10] sm:$0xff] }
  0xed   :  { %1123 = vmatpush.bf16.msrb.mxu2 %v1724_v55 }
  0xee   :  { %823 = vmatmul.bf16.vlgmr.msra.gmra.mxu3 %v382_v60 }
  0xef   :  { %1030 = vmatpush.bf16.msra.mxu0 %v1702_v8 }
  0xf1   :  { %1124 = vmatpush.bf16.msrb.mxu2 %v1723_v56 }
  0xf5   :  { %1125 = vmatpush.bf16.msrb.mxu2 %v1722_v57 }
  0xf9   :  { %1126 = vmatpush.bf16.msrb.mxu2 %v1721_v58 }
  0xfd   :  { %1127 = vmatpush.bf16.msrb.mxu2 %v1720_v59 }
  0xfe   :  { %879 = vmatmul.bf16.vlgmr.msrb.gmra.mxu3 %v382_v60  ;;  %v1719_v60 = vld [vmem:[#allocation11 + $0x8] sm:$0xff] }
 0x101   :  { %1128 = vmatpush.bf16.msrb.mxu2 %v1719_v60 }
 0x105   :  { %1129 = vmatpush.bf16.msrb.mxu2 %v1718_v61 }
 0x14a   :  { %v796_v13 = vpop.f32.mrf.mxu1 }
 0x14f   :  { %v782_v11 = vpop.f32.mrf.mxu0 }
 0x150   :  { %v783_v20 = vadd.f32 %v782_v11, %v449_v17 }
 0x152   :  { %v798_v22 = vpop.f32.mrf.mxu1  ;;  %v797_v25 = vadd.f32 %v796_v13, %v783_v20 }
 0x155   :  { %v810_v15 = vpop.f32.mrf.mxu2 }
 0x156   :  { %v811_v27 = vadd.f32 %v810_v15, %v797_v25 }
 0x157   :  { %v784_v18 = vpop.f32.mrf.mxu0 }
 0x158   :  { %v785_v7 = vadd.f32 %v784_v18, %v449_v17 }
 0x15a   :  { %v799_v28 = vadd.f32 %v798_v22, %v785_v7  ;;  %v852_v33 = vpop.f32.mrf.mxu1 }
 0x15d   :  { %v812_v23 = vpop.f32.mrf.mxu2 }
 0x15e   :  { %v813_v29 = vadd.f32 %v812_v23, %v799_v28 }
 0x15f   :  { %v838_v26 = vpop.f32.mrf.mxu0 }
 0x160   :  { %v839_v21 = vadd.f32 %v838_v26, %v450_v35 }
 0x162   :  { %v853_v42 = vadd.f32 %v852_v33, %v839_v21  ;;  %v854_v43 = vpop.f32.mrf.mxu1 }
 0x165   :  { %v866_v34 = vpop.f32.mrf.mxu2 }
 0x166   :  { %v867_v45 = vadd.f32 %v866_v34, %v853_v42 }
 0x167   :  { %v840_v39 = vpop.f32.mrf.mxu0 }
 0x168   :  { %v841_v41 = vadd.f32 %v840_v39, %v450_v35 }
 0x16a   :  { %v855_v46 = vadd.f32 %v854_v43, %v841_v41 }
 0x16d   :  { %v868_v44 = vpop.f32.mrf.mxu2 }
 0x16e   :  { %v869_v47 = vadd.f32 %v868_v44, %v855_v46 }
 0x171   :  { %v824_v24 = vpop.f32.mrf.mxu3 }
 0x172   :  { %v825_v30 = vadd.f32 %v824_v24, %v811_v27 }
 0x174   :  { %v885_v36 = vmax.f32 %v825_v30, 0.0 }
 0x179   :  { %v826_v31 = vpop.f32.mrf.mxu3 }
 0x17a   :  { %v827_v32 = vadd.f32 %v826_v31, %v813_v29 }
 0x17c   :  { %v887_v37 = vmax.f32 %v827_v32, 0.0 }
 0x17e   :  { %v889_v38 = vpack.c.bf16 %v887_v37, %v885_v36 }
 0x180   :  { %1031 = vmatmul.bf16.vlgmr.msra.gmra.mxu0 %v889_v38 }
 0x181   :  { %v880_v40 = vpop.f32.mrf.mxu3 }
 0x182   :  { %v881_v48 = vadd.f32 %v880_v40, %v867_v45 }
 0x184   :  { %v886_v51 = vmax.f32 %v881_v48, 0.0 }
 0x189   :  { %v882_v49 = vpop.f32.mrf.mxu3 }
 0x18a   :  { %v883_v50 = vadd.f32 %v882_v49, %v869_v47 }
 0x18c   :  { %v888_v52 = vmax.f32 %v883_v50, 0.0 }
 0x18e   :  { %v890_v53 = vpack.c.bf16 %v888_v52, %v886_v51 }
 0x190   :  { %1045 = vmatmul.bf16.vlgmr.msrb.gmra.mxu1 %v890_v53 }
 0x1fd   :  { %v1032_v62 = vpop.f32.mrf.mxu0 }
 0x1fe   :  { %v1033_v1 = vadd.f32 %v1745_v0, %v1032_v62 }
 0x205   :  { %v1034_v2 = vpop.f32.mrf.mxu0 }
 0x206   :  { %v1035_v4 = vadd.f32 %v1745_v0, %v1034_v2 }
 0x20d   :  { %v1046_v63 = vpop.f32.mrf.mxu1 }
 0x20e   :  { %v1047_v5 = vadd.f32 %v1046_v63, %v1033_v1 }
 0x210   :  { %v1051_v8 = vmax.f32 %v1047_v5, 0.0 }
 0x215   :  { %v1048_v3 = vpop.f32.mrf.mxu1 }
 0x216   :  { %v1049_v6 = vadd.f32 %v1048_v3, %v1035_v4 }
 0x218   :  { %v1052_v9 = vmax.f32 %v1049_v6, 0.0 }
 0x21a   :  { %v1053_v10 = vpack.c.bf16 %v1052_v9, %v1051_v8 }
 0x21c   :  { %1130 = vmatmul.bf16.vlgmr.msrb.gmra.mxu2 %v1053_v10 }
 0x29f   :  { %v1131_v11 = vpop.f32.mrf.mxu2 }
 0x2a0   :  { %v1132_v14 = vadd.f32 %v1746_v12, %v1131_v11 }
 0x2a7   :  { %v1133_v13 = vpop.f32.mrf.mxu2 }
 0x2a8   :  { %v1134_v15 = vadd.f32 %v1746_v12, %v1133_v13 }
 0x2aa   :  { %v1729_v16 = vpack.c.bf16 %v1134_v15, %v1132_v14 }
 0x2ac   :  { %1730 = vst [vmem:[#allocation13] sm:$0xff] %v1729_v16  }
 0x2ad   :  { %1152 = dma.vmem_to_hbm [thread:$0]  %s1145_s1, 128, %s1147_s25, [#allocation4], %s1934_s16, %s1934_s16, %s1935_s17  }
 0x2ae   :  { %1923 = dma.done.wait [#allocation4], 128  }
 0x2af   :  { %1924 = vsyncadd [#allocation4], 4294967168 }
 0x2b0   :  { %1157 = vsyncpa [#allocation3], 1 }
 0x2b1   :  { %1158 = vsyncpa [#allocation6], 1 }
 0x2b2   :  { %1159 = vsyncpa [#allocation9], 1 }
 0x2b3   :  { %1160 = vsyncpa [#allocation12], 1 }
 0x2b4   :  { %1161 = vsyncpa [#allocation4], 1 }

</bundles_post_ra>
